<compile_context>
chip_gen: v7x
topology: tpu7x:2x2x1
jax: 0.10.0
libtpu: 0.0.40
codegen_flags: <defaults>
</compile_context>

<pallas_src>
import math

import jax
import jax.numpy as jnp
from jax import lax
from jax.experimental import pallas as pl
from jax.experimental.pallas import tpu as pltpu

# ---------------- configuration (small synthetic shapes) ----------------
B = 2            # batch
S = 8            # sequence length
D = 32           # model size
H = 4            # num heads
HD = D // H      # head size
FF = 64          # feed-forward size
N = B * S        # tokens per call (batch folded into rows)
EPS = 1e-6
NEG = -1e30      # finite additive mask value (avoids -inf -> NaN on fully-masked rows)

# ----- bf16 weight slab layout, shape (W_ROWS, D): sliced with free sublane views -----
W_A   = 0                  # rows [W_A  + h*D, +D): A_h = (Wq_h/sqrt(HD)) @ Wk_h^T  (D, D)
W_M   = H * D              # rows [W_M  + h*D, +D): M_h = Wv_h @ Wo_h               (D, D)
W_W1T = 2 * H * D          # rows [W_W1T, +FF)    : W1^T                            (FF, D)
W_W2  = W_W1T + FF         # rows [W_W2,  +FF)    : W2                              (FF, D)
W_ROWS = W_W2 + FF         # 384

# ----- f32 parameter slab layout, shape (P_ROWS, FF) -----
P_LN1_W, P_LN1_B, P_LN2_W, P_LN2_B = 0, 1, 2, 3
P_B_ATTN = 4               # sum_h bv_h @ Wo_h + bo   (1, D)
P_B2     = 5               # second FFN bias          (1, D)
P_B1     = 6               # first FFN bias           (1, FF)
P_R      = 7               # row P_R + h: r_h = (bq_h/sqrt(HD)) @ Wk_h^T   (1, D)
P_ROWS   = P_R + H         # 11


def _layernorm(x, w, b):
    # BertLayerNorm: population variance over last dim, eps inside sqrt; rsqrt -> EUP.
    u = jnp.mean(x, axis=-1, keepdims=True)
    s = jnp.mean((x - u) ** 2, axis=-1, keepdims=True)
    return (x - u) * lax.rsqrt(s + EPS) * w + b


def _gelu(x):
    # BERT tanh-approximation GeLU (matches the GeLU module in the reference repo).
    c = 0.7978845608028654  # sqrt(2/pi)
    return 0.5 * x * (1.0 + jnp.tanh(c * (x + 0.044715 * x * x * x)))


def encoder_layer_kernel(x_ref, bias_ref, w_ref, p_ref, o_ref):
    x = x_ref[...]                                     # (N, D) f32
    bias = bias_ref[...]                               # (N, N) f32 additive attention mask

    # ---------------- self-attention block (pre-norm) ----------------
    xn = _layernorm(x, p_ref[P_LN1_W:P_LN1_W + 1, :D], p_ref[P_LN1_B:P_LN1_B + 1, :D])
    xn_b = xn.astype(jnp.bfloat16)

    acc = jnp.zeros((N, D), jnp.float32)
    for h in range(H):                                 # static unroll, H = 4
        a_h = w_ref[W_A + h * D:W_A + (h + 1) * D, :]  # (D, D) bf16, free sublane view
        m_h = w_ref[W_M + h * D:W_M + (h + 1) * D, :]  # (D, D) bf16, free sublane view
        r_h = p_ref[P_R + h:P_R + h + 1, :D]           # (1, D) f32

        # scores (up to a per-query constant, which the softmax ignores)
        t = jnp.dot(xn_b, a_h, preferred_element_type=jnp.float32) + r_h          # (N, D)
        s = jnp.einsum('qd,kd->qk', t.astype(jnp.bfloat16), xn_b,
                       preferred_element_type=jnp.float32) + bias                 # (N, N)

        # softmax over keys; masked / cross-batch keys sit at -1e30 -> weight exactly 0
        m = jnp.max(s, axis=-1, keepdims=True)
        e = jnp.exp(s - m)
        attn = e / jnp.sum(e, axis=-1, keepdims=True)  # exact reciprocal (tiny denom count)

        # per-head context already projected to model dims; heads simply SUM
        vw = jnp.dot(xn_b, m_h, preferred_element_type=jnp.float32)               # (N, D)
        acc = acc + jnp.dot(attn.astype(jnp.bfloat16), vw.astype(jnp.bfloat16),
                            preferred_element_type=jnp.float32)

    attn_out = acc + p_ref[P_B_ATTN:P_B_ATTN + 1, :D]
    h1 = attn_out + x                                  # dropout = identity (eval)

    # ---------------- position-wise feed forward ----------------
    hn = _layernorm(h1, p_ref[P_LN2_W:P_LN2_W + 1, :D], p_ref[P_LN2_B:P_LN2_B + 1, :D])
    w1t = w_ref[W_W1T:W_W1T + FF, :]                   # (FF, D) bf16
    w2 = w_ref[W_W2:W_W2 + FF, :]                      # (FF, D) bf16
    f1 = jnp.einsum('nd,fd->nf', hn.astype(jnp.bfloat16), w1t,
                    preferred_element_type=jnp.float32) + p_ref[P_B1:P_B1 + 1, :FF]
    g = _gelu(f1)
    f2 = jnp.dot(g.astype(jnp.bfloat16), w2,
                 preferred_element_type=jnp.float32) + p_ref[P_B2:P_B2 + 1, :D]
    o_ref[...] = (f2 + h1).astype(o_ref.dtype)


def transformer_encoder_layer(x, mask, w_slab, p_slab):
    """x: (B, S, D) float32; mask: (B, 1, S) float32 (1 keep / 0 masked)."""
    x2 = x.reshape(N, D)

    # additive attention bias: 0 for (same-batch, kept key), -1e30 otherwise (wrapper-side).
    keep = mask[:, 0, :].reshape(1, N)                                        # (1, N)
    same_batch = jnp.repeat(jnp.repeat(jnp.eye(B, dtype=x.dtype), S, axis=0), S, axis=1)
    attn_bias = (1.0 - same_batch * keep) * NEG                               # (N, N)

    out = pl.pallas_call(
        encoder_layer_kernel,
        out_shape=jax.ShapeDtypeStruct((N, D), jnp.float32),
        in_specs=[pl.BlockSpec(memory_space=pltpu.MemorySpace.VMEM)] * 4,
        out_specs=pl.BlockSpec(memory_space=pltpu.MemorySpace.VMEM),
    )(x2, attn_bias, w_slab, p_slab)
    # TODO(synk): at real sizes (D>=512, S>=512) switch to a flash-style grid
    # (q-blocks 'parallel' x kv-blocks 'arbitrary') so v7x's second TensorCore is used
    # and score tiles fit VMEM; at these toy sizes any grid is pure overhead.
    return out.reshape(B, S, D)


def init_params(key):
    """Deterministic synthetic parameters in (in, out) layout (== PyTorch x @ W.T + b)."""
    ks = jax.random.split(key, 6)

    def lin(k, n_in, n_out):
        w = jax.random.normal(k, (n_in, n_out), jnp.float32) * (1.0 / math.sqrt(n_in))
        b = jnp.full((1, n_out), 0.01, jnp.float32)
        return w, b

    wq, bq = lin(ks[0], D, D)
    wk, bk = lin(ks[1], D, D)
    wv, bv = lin(ks[2], D, D)
    wo, bo = lin(ks[3], D, D)
    w1, b1 = lin(ks[4], D, FF)
    w2, b2 = lin(ks[5], FF, D)
    return dict(ln1_w=jnp.ones((D,), jnp.float32), ln1_b=jnp.zeros((D,), jnp.float32),
                ln2_w=jnp.ones((D,), jnp.float32), ln2_b=jnp.zeros((D,), jnp.float32),
                wq=wq, bq=bq, wk=wk, bk=bk, wv=wv, bv=bv, wo=wo, bo=bo,
                w1=w1, b1=b1, w2=w2, b2=b2)


def pack_params(p):
    """Fold per-head weights into head-combined matrices and pack everything into ONE
    bf16 weight slab + ONE f32 parameter slab (wrapper-side, free XLA work).

    bk never appears: the key bias only shifts each score row by a constant, which
    softmax ignores. bq enters through r_h; bv/bo through b_attn.
    """
    scale = 1.0 / math.sqrt(HD)
    a_blocks, m_blocks, r_rows = [], [], []
    b_attn = p['bo']
    for h in range(H):
        sl = slice(h * HD, (h + 1) * HD)
        wq_h, wk_h, wv_h = p['wq'][:, sl], p['wk'][:, sl], p['wv'][:, sl]
        wo_h = p['wo'][sl, :]                             # (HD, D)
        a_blocks.append((wq_h * scale) @ wk_h.T)          # (D, D)
        m_blocks.append(wv_h @ wo_h)                      # (D, D)
        r_rows.append((p['bq'][:, sl] * scale) @ wk_h.T)  # (1, D)
        b_attn = b_attn + p['bv'][:, sl] @ wo_h           # (1, D)

    w_slab = jnp.concatenate(a_blocks + m_blocks + [p['w1'].T, p['w2']],
                             axis=0).astype(jnp.bfloat16)             # (W_ROWS, D)

    def row(v):
        v = jnp.asarray(v, jnp.float32).reshape(1, -1)
        return jnp.pad(v, ((0, 0), (0, FF - v.shape[1])))

    p_rows = [row(p['ln1_w']), row(p['ln1_b']), row(p['ln2_w']), row(p['ln2_b']),
              row(b_attn), row(p['b2']), row(p['b1'])] + [row(r) for r in r_rows]
    p_slab = jnp.concatenate(p_rows, axis=0)                          # (P_ROWS, FF)

    assert w_slab.shape == (W_ROWS, D) and p_slab.shape == (P_ROWS, FF)
    return w_slab, p_slab


def reference_layer(x, mask, p):
    """Straightforward pure-JAX port of the PyTorch module (eval mode), for checking."""
    def ln(t, w, b):
        u = t.mean(-1, keepdims=True)
        s = ((t - u) ** 2).mean(-1, keepdims=True)
        return (t - u) / jnp.sqrt(s + EPS) * w + b

    xn = ln(x, p['ln1_w'], p['ln1_b'])                                          # (B, S, D)
    q = (xn @ p['wq'] + p['bq']).reshape(B, S, H, HD).transpose(0, 2, 1, 3) / math.sqrt(HD)
    k = (xn @ p['wk'] + p['bk']).reshape(B, S, H, HD).transpose(0, 2, 1, 3)
    v = (xn @ p['wv'] + p['bv']).reshape(B, S, H, HD).transpose(0, 2, 1, 3)
    scores = jnp.einsum('bhqd,bhkd->bhqk', q, k) + (1.0 - mask[:, None, :, :]) * NEG
    attn = jax.nn.softmax(scores, axis=-1)
    ctx = jnp.einsum('bhqk,bhkd->bhqd', attn, v).transpose(0, 2, 1, 3).reshape(B, S, D)
    h1 = ctx @ p['wo'] + p['bo'] + x
    hn = ln(h1, p['ln2_w'], p['ln2_b'])
    return _gelu(hn @ p['w1'] + p['b1']) @ p['w2'] + p['b2'] + h1


if __name__ == "__main__":
    key = jax.random.PRNGKey(0)
    k_x, k_p = jax.random.split(key)

    x = jax.random.normal(k_x, (B, S, D), jnp.float32)
    # mask: (B, 1, S); batch 0 fully valid, batch 1 has last 2 keys masked
    mask = jnp.ones((B, 1, S), jnp.float32)
    mask = mask.at[1, 0, S - 2:].set(0.0)

    params = init_params(k_p)
    w_slab, p_slab = pack_params(params)

    out = transformer_encoder_layer(x, mask, w_slab, p_slab)
    out = jax.block_until_ready(out)

    assert out.shape == (B, S, D)
    assert bool(jnp.all(jnp.isfinite(out)))

    # loose tolerance: kernel rounds MXU operands to bf16 (f32 accumulation)
    ref = reference_layer(x, mask, params)
    err = float(jnp.max(jnp.abs(out - ref)))
    assert err < 0.15, f"max abs error vs reference: {err}"

    print("KERNEL_OK")
</pallas_src>

<mosaic_0001>
module attributes {stable_mosaic.version = 11 : i64} {
  func.func @encoder_layer_kernel(%arg0: memref<16x32xf32, #tpu.memory_space<vmem>>, %arg1: memref<16x16xf32, #tpu.memory_space<vmem>>, %arg2: memref<384x32xbf16, #tpu.memory_space<vmem>>, %arg3: memref<11x64xf32, #tpu.memory_space<vmem>>, %arg4: memref<16x32xf32, #tpu.memory_space<vmem>>) attributes {dimension_semantics = [], scalar_prefetch = 0 : i64, scratch_operands = 0 : i64, tpu.core_type = #tpu.core_type<tc>} {
    %c0 = arith.constant 0 : index
    %c0_0 = arith.constant 0 : index
    %0 = vector.load %arg0[%c0, %c0_0] : memref<16x32xf32, #tpu.memory_space<vmem>>, vector<16x32xf32>
    %c0_1 = arith.constant 0 : index
    %c0_2 = arith.constant 0 : index
    %1 = vector.load %arg1[%c0_1, %c0_2] : memref<16x16xf32, #tpu.memory_space<vmem>>, vector<16x16xf32>
    %c0_3 = arith.constant 0 : index
    %c0_4 = arith.constant 0 : index
    %2 = vector.load %arg3[%c0_3, %c0_4] : memref<11x64xf32, #tpu.memory_space<vmem>>, vector<1x32xf32>
    %c1 = arith.constant 1 : index
    %c0_5 = arith.constant 0 : index
    %3 = vector.load %arg3[%c1, %c0_5] : memref<11x64xf32, #tpu.memory_space<vmem>>, vector<1x32xf32>
    %cst = arith.constant dense<0.000000e+00> : vector<16xf32>
    %4 = vector.multi_reduction <add>, %0, %cst [1] : vector<16x32xf32> to vector<16xf32>
    %5 = vector.shape_cast %4 : vector<16xf32> to vector<16x1xf32>
    %cst_6 = arith.constant 3.200000e+01 : f32
    %6 = vector.broadcast %cst_6 : f32 to vector<16x1xf32>
    %7 = arith.divf %5, %6 : vector<16x1xf32>
    %8 = vector.broadcast %7 : vector<16x1xf32> to vector<16x32xf32>
    %9 = arith.subf %0, %8 : vector<16x32xf32>
    %10 = arith.mulf %9, %9 : vector<16x32xf32>
    %cst_7 = arith.constant dense<0.000000e+00> : vector<16xf32>
    %11 = vector.multi_reduction <add>, %10, %cst_7 [1] : vector<16x32xf32> to vector<16xf32>
    %12 = vector.shape_cast %11 : vector<16xf32> to vector<16x1xf32>
    %cst_8 = arith.constant 3.200000e+01 : f32
    %13 = vector.broadcast %cst_8 : f32 to vector<16x1xf32>
    %14 = arith.divf %12, %13 : vector<16x1xf32>
    %15 = vector.broadcast %7 : vector<16x1xf32> to vector<16x32xf32>
    %16 = arith.subf %0, %15 : vector<16x32xf32>
    %cst_9 = arith.constant 9.99999997E-7 : f32
    %17 = vector.broadcast %cst_9 : f32 to vector<16x1xf32>
    %18 = arith.addf %14, %17 : vector<16x1xf32>
    %19 = math.rsqrt %18 : vector<16x1xf32>
    %20 = vector.broadcast %19 : vector<16x1xf32> to vector<16x32xf32>
    %21 = arith.mulf %16, %20 : vector<16x32xf32>
    %22 = vector.broadcast %2 : vector<1x32xf32> to vector<16x32xf32>
    %23 = arith.mulf %21, %22 : vector<16x32xf32>
    %24 = vector.broadcast %3 : vector<1x32xf32> to vector<16x32xf32>
    %25 = arith.addf %23, %24 : vector<16x32xf32>
    %26 = arith.truncf %25 : vector<16x32xf32> to vector<16x32xbf16>
    %cst_10 = arith.constant 0.000000e+00 : f32
    %27 = vector.broadcast %cst_10 : f32 to vector<16x32xf32>
    %c0_11 = arith.constant 0 : index
    %c0_12 = arith.constant 0 : index
    %28 = vector.load %arg2[%c0_11, %c0_12] : memref<384x32xbf16, #tpu.memory_space<vmem>>, vector<32x32xbf16>
    %c128 = arith.constant 128 : index
    %c0_13 = arith.constant 0 : index
    %29 = vector.load %arg2[%c128, %c0_13] : memref<384x32xbf16, #tpu.memory_space<vmem>>, vector<32x32xbf16>
    %c7 = arith.constant 7 : index
    %c0_14 = arith.constant 0 : index
    %30 = vector.load %arg3[%c7, %c0_14] : memref<11x64xf32, #tpu.memory_space<vmem>>, vector<1x32xf32>
    %cst_15 = arith.constant dense<0.000000e+00> : vector<16x32xf32>
    %31 = tpu.matmul %26, %28, %cst_15 {dimension_numbers = #tpu.dot_dimension_numbers<[1], [0], [0], [1], [0, 0, 1, 1], [], []>} : vector<16x32xbf16>, vector<32x32xbf16>, vector<16x32xf32> -> vector<16x32xf32>
    %32 = vector.broadcast %30 : vector<1x32xf32> to vector<16x32xf32>
    %33 = arith.addf %31, %32 : vector<16x32xf32>
    %34 = arith.truncf %33 : vector<16x32xf32> to vector<16x32xbf16>
    "tpu.trace_start"() <{level = 10 : i32, message = "qd,kd->qk"}> : () -> ()
    %cst_16 = arith.constant dense<0.000000e+00> : vector<16x16xf32>
    %35 = tpu.matmul %34, %26, %cst_16 {dimension_numbers = #tpu.dot_dimension_numbers<[1], [1], [0], [0], [0, 0, 1, 0], [], []>} : vector<16x32xbf16>, vector<16x32xbf16>, vector<16x16xf32> -> vector<16x16xf32>
    "tpu.trace_stop"() : () -> ()
    %36 = arith.addf %35, %1 : vector<16x16xf32>
    %cst_17 = arith.constant dense<0xFF800000> : vector<16xf32>
    %37 = vector.multi_reduction <maximumf>, %36, %cst_17 [1] : vector<16x16xf32> to vector<16xf32>
    %38 = vector.shape_cast %37 : vector<16xf32> to vector<16x1xf32>
    %39 = vector.broadcast %38 : vector<16x1xf32> to vector<16x16xf32>
    %40 = arith.subf %36, %39 : vector<16x16xf32>
    %41 = math.exp %40 : vector<16x16xf32>
    %cst_18 = arith.constant dense<0.000000e+00> : vector<16xf32>
    %42 = vector.multi_reduction <add>, %41, %cst_18 [1] : vector<16x16xf32> to vector<16xf32>
    %43 = vector.shape_cast %42 : vector<16xf32> to vector<16x1xf32>
    %44 = vector.broadcast %43 : vector<16x1xf32> to vector<16x16xf32>
    %45 = arith.divf %41, %44 : vector<16x16xf32>
    %cst_19 = arith.constant dense<0.000000e+00> : vector<16x32xf32>
    %46 = tpu.matmul %26, %29, %cst_19 {dimension_numbers = #tpu.dot_dimension_numbers<[1], [0], [0], [1], [0, 0, 1, 1], [], []>} : vector<16x32xbf16>, vector<32x32xbf16>, vector<16x32xf32> -> vector<16x32xf32>
    %47 = arith.truncf %45 : vector<16x16xf32> to vector<16x16xbf16>
    %48 = arith.truncf %46 : vector<16x32xf32> to vector<16x32xbf16>
    %cst_20 = arith.constant dense<0.000000e+00> : vector<16x32xf32>
    %49 = tpu.matmul %47, %48, %cst_20 {dimension_numbers = #tpu.dot_dimension_numbers<[1], [0], [0], [1], [0, 0, 1, 1], [], []>} : vector<16x16xbf16>, vector<16x32xbf16>, vector<16x32xf32> -> vector<16x32xf32>
    %50 = arith.addf %27, %49 : vector<16x32xf32>
    %c32 = arith.constant 32 : index
    %c0_21 = arith.constant 0 : index
    %51 = vector.load %arg2[%c32, %c0_21] : memref<384x32xbf16, #tpu.memory_space<vmem>>, vector<32x32xbf16>
    %c160 = arith.constant 160 : index
    %c0_22 = arith.constant 0 : index
    %52 = vector.load %arg2[%c160, %c0_22] : memref<384x32xbf16, #tpu.memory_space<vmem>>, vector<32x32xbf16>
    %c8 = arith.constant 8 : index
    %c0_23 = arith.constant 0 : index
    %53 = vector.load %arg3[%c8, %c0_23] : memref<11x64xf32, #tpu.memory_space<vmem>>, vector<1x32xf32>
    %cst_24 = arith.constant dense<0.000000e+00> : vector<16x32xf32>
    %54 = tpu.matmul %26, %51, %cst_24 {dimension_numbers = #tpu.dot_dimension_numbers<[1], [0], [0], [1], [0, 0, 1, 1], [], []>} : vector<16x32xbf16>, vector<32x32xbf16>, vector<16x32xf32> -> vector<16x32xf32>
    %55 = vector.broadcast %53 : vector<1x32xf32> to vector<16x32xf32>
    %56 = arith.addf %54, %55 : vector<16x32xf32>
    %57 = arith.truncf %56 : vector<16x32xf32> to vector<16x32xbf16>
    "tpu.trace_start"() <{level = 10 : i32, message = "qd,kd->qk"}> : () -> ()
    %cst_25 = arith.constant dense<0.000000e+00> : vector<16x16xf32>
    %58 = tpu.matmul %57, %26, %cst_25 {dimension_numbers = #tpu.dot_dimension_numbers<[1], [1], [0], [0], [0, 0, 1, 0], [], []>} : vector<16x32xbf16>, vector<16x32xbf16>, vector<16x16xf32> -> vector<16x16xf32>
    "tpu.trace_stop"() : () -> ()
    %59 = arith.addf %58, %1 : vector<16x16xf32>
    %cst_26 = arith.constant dense<0xFF800000> : vector<16xf32>
    %60 = vector.multi_reduction <maximumf>, %59, %cst_26 [1] : vector<16x16xf32> to vector<16xf32>
    %61 = vector.shape_cast %60 : vector<16xf32> to vector<16x1xf32>
    %62 = vector.broadcast %61 : vector<16x1xf32> to vector<16x16xf32>
    %63 = arith.subf %59, %62 : vector<16x16xf32>
    %64 = math.exp %63 : vector<16x16xf32>
    %cst_27 = arith.constant dense<0.000000e+00> : vector<16xf32>
    %65 = vector.multi_reduction <add>, %64, %cst_27 [1] : vector<16x16xf32> to vector<16xf32>
    %66 = vector.shape_cast %65 : vector<16xf32> to vector<16x1xf32>
    %67 = vector.broadcast %66 : vector<16x1xf32> to vector<16x16xf32>
    %68 = arith.divf %64, %67 : vector<16x16xf32>
    %cst_28 = arith.constant dense<0.000000e+00> : vector<16x32xf32>
    %69 = tpu.matmul %26, %52, %cst_28 {dimension_numbers = #tpu.dot_dimension_numbers<[1], [0], [0], [1], [0, 0, 1, 1], [], []>} : vector<16x32xbf16>, vector<32x32xbf16>, vector<16x32xf32> -> vector<16x32xf32>
    %70 = arith.truncf %68 : vector<16x16xf32> to vector<16x16xbf16>
    %71 = arith.truncf %69 : vector<16x32xf32> to vector<16x32xbf16>
    %cst_29 = arith.constant dense<0.000000e+00> : vector<16x32xf32>
    %72 = tpu.matmul %70, %71, %cst_29 {dimension_numbers = #tpu.dot_dimension_numbers<[1], [0], [0], [1], [0, 0, 1, 1], [], []>} : vector<16x16xbf16>, vector<16x32xbf16>, vector<16x32xf32> -> vector<16x32xf32>
    %73 = arith.addf %50, %72 : vector<16x32xf32>
    %c64 = arith.constant 64 : index
    %c0_30 = arith.constant 0 : index
    %74 = vector.load %arg2[%c64, %c0_30] : memref<384x32xbf16, #tpu.memory_space<vmem>>, vector<32x32xbf16>
    %c192 = arith.constant 192 : index
    %c0_31 = arith.constant 0 : index
    %75 = vector.load %arg2[%c192, %c0_31] : memref<384x32xbf16, #tpu.memory_space<vmem>>, vector<32x32xbf16>
    %c9 = arith.constant 9 : index
    %c0_32 = arith.constant 0 : index
    %76 = vector.load %arg3[%c9, %c0_32] : memref<11x64xf32, #tpu.memory_space<vmem>>, vector<1x32xf32>
    %cst_33 = arith.constant dense<0.000000e+00> : vector<16x32xf32>
    %77 = tpu.matmul %26, %74, %cst_33 {dimension_numbers = #tpu.dot_dimension_numbers<[1], [0], [0], [1], [0, 0, 1, 1], [], []>} : vector<16x32xbf16>, vector<32x32xbf16>, vector<16x32xf32> -> vector<16x32xf32>
    %78 = vector.broadcast %76 : vector<1x32xf32> to vector<16x32xf32>
    %79 = arith.addf %77, %78 : vector<16x32xf32>
    %80 = arith.truncf %79 : vector<16x32xf32> to vector<16x32xbf16>
    "tpu.trace_start"() <{level = 10 : i32, message = "qd,kd->qk"}> : () -> ()
    %cst_34 = arith.constant dense<0.000000e+00> : vector<16x16xf32>
    %81 = tpu.matmul %80, %26, %cst_34 {dimension_numbers = #tpu.dot_dimension_numbers<[1], [1], [0], [0], [0, 0, 1, 0], [], []>} : vector<16x32xbf16>, vector<16x32xbf16>, vector<16x16xf32> -> vector<16x16xf32>
    "tpu.trace_stop"() : () -> ()
    %82 = arith.addf %81, %1 : vector<16x16xf32>
    %cst_35 = arith.constant dense<0xFF800000> : vector<16xf32>
    %83 = vector.multi_reduction <maximumf>, %82, %cst_35 [1] : vector<16x16xf32> to vector<16xf32>
    %84 = vector.shape_cast %83 : vector<16xf32> to vector<16x1xf32>
    %85 = vector.broadcast %84 : vector<16x1xf32> to vector<16x16xf32>
    %86 = arith.subf %82, %85 : vector<16x16xf32>
    %87 = math.exp %86 : vector<16x16xf32>
    %cst_36 = arith.constant dense<0.000000e+00> : vector<16xf32>
    %88 = vector.multi_reduction <add>, %87, %cst_36 [1] : vector<16x16xf32> to vector<16xf32>
    %89 = vector.shape_cast %88 : vector<16xf32> to vector<16x1xf32>
    %90 = vector.broadcast %89 : vector<16x1xf32> to vector<16x16xf32>
    %91 = arith.divf %87, %90 : vector<16x16xf32>
    %cst_37 = arith.constant dense<0.000000e+00> : vector<16x32xf32>
    %92 = tpu.matmul %26, %75, %cst_37 {dimension_numbers = #tpu.dot_dimension_numbers<[1], [0], [0], [1], [0, 0, 1, 1], [], []>} : vector<16x32xbf16>, vector<32x32xbf16>, vector<16x32xf32> -> vector<16x32xf32>
    %93 = arith.truncf %91 : vector<16x16xf32> to vector<16x16xbf16>
    %94 = arith.truncf %92 : vector<16x32xf32> to vector<16x32xbf16>
    %cst_38 = arith.constant dense<0.000000e+00> : vector<16x32xf32>
    %95 = tpu.matmul %93, %94, %cst_38 {dimension_numbers = #tpu.dot_dimension_numbers<[1], [0], [0], [1], [0, 0, 1, 1], [], []>} : vector<16x16xbf16>, vector<16x32xbf16>, vector<16x32xf32> -> vector<16x32xf32>
    %96 = arith.addf %73, %95 : vector<16x32xf32>
    %c96 = arith.constant 96 : index
    %c0_39 = arith.constant 0 : index
    %97 = vector.load %arg2[%c96, %c0_39] : memref<384x32xbf16, #tpu.memory_space<vmem>>, vector<32x32xbf16>
    %c224 = arith.constant 224 : index
    %c0_40 = arith.constant 0 : index
    %98 = vector.load %arg2[%c224, %c0_40] : memref<384x32xbf16, #tpu.memory_space<vmem>>, vector<32x32xbf16>
    %c10 = arith.constant 10 : index
    %c0_41 = arith.constant 0 : index
    %99 = vector.load %arg3[%c10, %c0_41] : memref<11x64xf32, #tpu.memory_space<vmem>>, vector<1x32xf32>
    %cst_42 = arith.constant dense<0.000000e+00> : vector<16x32xf32>
    %100 = tpu.matmul %26, %97, %cst_42 {dimension_numbers = #tpu.dot_dimension_numbers<[1], [0], [0], [1], [0, 0, 1, 1], [], []>} : vector<16x32xbf16>, vector<32x32xbf16>, vector<16x32xf32> -> vector<16x32xf32>
    %101 = vector.broadcast %99 : vector<1x32xf32> to vector<16x32xf32>
    %102 = arith.addf %100, %101 : vector<16x32xf32>
    %103 = arith.truncf %102 : vector<16x32xf32> to vector<16x32xbf16>
    "tpu.trace_start"() <{level = 10 : i32, message = "qd,kd->qk"}> : () -> ()
    %cst_43 = arith.constant dense<0.000000e+00> : vector<16x16xf32>
    %104 = tpu.matmul %103, %26, %cst_43 {dimension_numbers = #tpu.dot_dimension_numbers<[1], [1], [0], [0], [0, 0, 1, 0], [], []>} : vector<16x32xbf16>, vector<16x32xbf16>, vector<16x16xf32> -> vector<16x16xf32>
    "tpu.trace_stop"() : () -> ()
    %105 = arith.addf %104, %1 : vector<16x16xf32>
    %cst_44 = arith.constant dense<0xFF800000> : vector<16xf32>
    %106 = vector.multi_reduction <maximumf>, %105, %cst_44 [1] : vector<16x16xf32> to vector<16xf32>
    %107 = vector.shape_cast %106 : vector<16xf32> to vector<16x1xf32>
    %108 = vector.broadcast %107 : vector<16x1xf32> to vector<16x16xf32>
    %109 = arith.subf %105, %108 : vector<16x16xf32>
    %110 = math.exp %109 : vector<16x16xf32>
    %cst_45 = arith.constant dense<0.000000e+00> : vector<16xf32>
    %111 = vector.multi_reduction <add>, %110, %cst_45 [1] : vector<16x16xf32> to vector<16xf32>
    %112 = vector.shape_cast %111 : vector<16xf32> to vector<16x1xf32>
    %113 = vector.broadcast %112 : vector<16x1xf32> to vector<16x16xf32>
    %114 = arith.divf %110, %113 : vector<16x16xf32>
    %cst_46 = arith.constant dense<0.000000e+00> : vector<16x32xf32>
    %115 = tpu.matmul %26, %98, %cst_46 {dimension_numbers = #tpu.dot_dimension_numbers<[1], [0], [0], [1], [0, 0, 1, 1], [], []>} : vector<16x32xbf16>, vector<32x32xbf16>, vector<16x32xf32> -> vector<16x32xf32>
    %116 = arith.truncf %114 : vector<16x16xf32> to vector<16x16xbf16>
    %117 = arith.truncf %115 : vector<16x32xf32> to vector<16x32xbf16>
    %cst_47 = arith.constant dense<0.000000e+00> : vector<16x32xf32>
    %118 = tpu.matmul %116, %117, %cst_47 {dimension_numbers = #tpu.dot_dimension_numbers<[1], [0], [0], [1], [0, 0, 1, 1], [], []>} : vector<16x16xbf16>, vector<16x32xbf16>, vector<16x32xf32> -> vector<16x32xf32>
    %119 = arith.addf %96, %118 : vector<16x32xf32>
    %c4 = arith.constant 4 : index
    %c0_48 = arith.constant 0 : index
    %120 = vector.load %arg3[%c4, %c0_48] : memref<11x64xf32, #tpu.memory_space<vmem>>, vector<1x32xf32>
    %121 = vector.broadcast %120 : vector<1x32xf32> to vector<16x32xf32>
    %122 = arith.addf %119, %121 : vector<16x32xf32>
    %123 = arith.addf %122, %0 : vector<16x32xf32>
    %c2 = arith.constant 2 : index
    %c0_49 = arith.constant 0 : index
    %124 = vector.load %arg3[%c2, %c0_49] : memref<11x64xf32, #tpu.memory_space<vmem>>, vector<1x32xf32>
    %c3 = arith.constant 3 : index
    %c0_50 = arith.constant 0 : index
    %125 = vector.load %arg3[%c3, %c0_50] : memref<11x64xf32, #tpu.memory_space<vmem>>, vector<1x32xf32>
    %cst_51 = arith.constant dense<0.000000e+00> : vector<16xf32>
    %126 = vector.multi_reduction <add>, %123, %cst_51 [1] : vector<16x32xf32> to vector<16xf32>
    %127 = vector.shape_cast %126 : vector<16xf32> to vector<16x1xf32>
    %cst_52 = arith.constant 3.200000e+01 : f32
    %128 = vector.broadcast %cst_52 : f32 to vector<16x1xf32>
    %129 = arith.divf %127, %128 : vector<16x1xf32>
    %130 = vector.broadcast %129 : vector<16x1xf32> to vector<16x32xf32>
    %131 = arith.subf %123, %130 : vector<16x32xf32>
    %132 = arith.mulf %131, %131 : vector<16x32xf32>
    %cst_53 = arith.constant dense<0.000000e+00> : vector<16xf32>
    %133 = vector.multi_reduction <add>, %132, %cst_53 [1] : vector<16x32xf32> to vector<16xf32>
    %134 = vector.shape_cast %133 : vector<16xf32> to vector<16x1xf32>
    %cst_54 = arith.constant 3.200000e+01 : f32
    %135 = vector.broadcast %cst_54 : f32 to vector<16x1xf32>
    %136 = arith.divf %134, %135 : vector<16x1xf32>
    %137 = vector.broadcast %129 : vector<16x1xf32> to vector<16x32xf32>
    %138 = arith.subf %123, %137 : vector<16x32xf32>
    %cst_55 = arith.constant 9.99999997E-7 : f32
    %139 = vector.broadcast %cst_55 : f32 to vector<16x1xf32>
    %140 = arith.addf %136, %139 : vector<16x1xf32>
    %141 = math.rsqrt %140 : vector<16x1xf32>
    %142 = vector.broadcast %141 : vector<16x1xf32> to vector<16x32xf32>
    %143 = arith.mulf %138, %142 : vector<16x32xf32>
    %144 = vector.broadcast %124 : vector<1x32xf32> to vector<16x32xf32>
    %145 = arith.mulf %143, %144 : vector<16x32xf32>
    %146 = vector.broadcast %125 : vector<1x32xf32> to vector<16x32xf32>
    %147 = arith.addf %145, %146 : vector<16x32xf32>
    %c256 = arith.constant 256 : index
    %c0_56 = arith.constant 0 : index
    %148 = vector.load %arg2[%c256, %c0_56] : memref<384x32xbf16, #tpu.memory_space<vmem>>, vector<64x32xbf16>
    %c320 = arith.constant 320 : index
    %c0_57 = arith.constant 0 : index
    %149 = vector.load %arg2[%c320, %c0_57] : memref<384x32xbf16, #tpu.memory_space<vmem>>, vector<64x32xbf16>
    %150 = arith.truncf %147 : vector<16x32xf32> to vector<16x32xbf16>
    "tpu.trace_start"() <{level = 10 : i32, message = "nd,fd->nf"}> : () -> ()
    %cst_58 = arith.constant dense<0.000000e+00> : vector<16x64xf32>
    %151 = tpu.matmul %150, %148, %cst_58 {dimension_numbers = #tpu.dot_dimension_numbers<[1], [1], [0], [0], [0, 0, 1, 0], [], []>} : vector<16x32xbf16>, vector<64x32xbf16>, vector<16x64xf32> -> vector<16x64xf32>
    "tpu.trace_stop"() : () -> ()
    %c6 = arith.constant 6 : index
    %c0_59 = arith.constant 0 : index
    %152 = vector.load %arg3[%c6, %c0_59] : memref<11x64xf32, #tpu.memory_space<vmem>>, vector<1x64xf32>
    %153 = vector.broadcast %152 : vector<1x64xf32> to vector<16x64xf32>
    %154 = arith.addf %151, %153 : vector<16x64xf32>
    %cst_60 = arith.constant 5.000000e-01 : f32
    %155 = vector.broadcast %cst_60 : f32 to vector<16x64xf32>
    %156 = arith.mulf %155, %154 : vector<16x64xf32>
    %cst_61 = arith.constant 4.471500e-02 : f32
    %157 = vector.broadcast %cst_61 : f32 to vector<16x64xf32>
    %158 = arith.mulf %157, %154 : vector<16x64xf32>
    %159 = arith.mulf %158, %154 : vector<16x64xf32>
    %160 = arith.mulf %159, %154 : vector<16x64xf32>
    %161 = arith.addf %154, %160 : vector<16x64xf32>
    %cst_62 = arith.constant 0.797884583 : f32
    %162 = vector.broadcast %cst_62 : f32 to vector<16x64xf32>
    %163 = arith.mulf %162, %161 : vector<16x64xf32>
    %164 = math.tanh %163 : vector<16x64xf32>
    %cst_63 = arith.constant 1.000000e+00 : f32
    %165 = vector.broadcast %cst_63 : f32 to vector<16x64xf32>
    %166 = arith.addf %165, %164 : vector<16x64xf32>
    %167 = arith.mulf %156, %166 : vector<16x64xf32>
    %168 = arith.truncf %167 : vector<16x64xf32> to vector<16x64xbf16>
    %cst_64 = arith.constant dense<0.000000e+00> : vector<16x32xf32>
    %169 = tpu.matmul %168, %149, %cst_64 {dimension_numbers = #tpu.dot_dimension_numbers<[1], [0], [0], [1], [0, 0, 1, 1], [], []>} : vector<16x64xbf16>, vector<64x32xbf16>, vector<16x32xf32> -> vector<16x32xf32>
    %c5 = arith.constant 5 : index
    %c0_65 = arith.constant 0 : index
    %170 = vector.load %arg3[%c5, %c0_65] : memref<11x64xf32, #tpu.memory_space<vmem>>, vector<1x32xf32>
    %171 = vector.broadcast %170 : vector<1x32xf32> to vector<16x32xf32>
    %172 = arith.addf %169, %171 : vector<16x32xf32>
    %173 = arith.addf %172, %123 : vector<16x32xf32>
    %c0_66 = arith.constant 0 : index
    %c0_67 = arith.constant 0 : index
    %174 = vector.load %arg4[%c0_66, %c0_67] : memref<16x32xf32, #tpu.memory_space<vmem>>, vector<16x32xf32>
    tpu.vector_store %arg4[%c0_66, %c0_67], %173 {strides = array<i32>} : memref<16x32xf32, #tpu.memory_space<vmem>>, vector<16x32xf32>,
    return
  }
}

</mosaic_0001>

<bundles_post_ra>
// kernel: tpu_custom_call.1
= control target key start
LH: loop header
LB: loop body
LE: loop exit
PB: predicated region body
PF: predicated region fallthrough
CT: control target
= control target key end

     0   :  { %vm25_vm0 = vcmask 261120   ;;  %s1922_s0 = inlined_call_operand.vmem [shape: f32[16,32], index: 0, kind: input, shape index: {}]   ;;  %s1923_s1 = inlined_call_operand.vmem [shape: f32[16,16], index: 1, kind: input, shape index: {}]   ;;  %s1924_s2 = inlined_call_operand.vmem [shape: bf16[384,32], index: 2, kind: input, shape index: {}]   ;;  %s1925_s3 = inlined_call_operand.vmem [shape: f32[11,64], index: 3, kind: input, shape index: {}]   ;;  %s1926_s4 = inlined_call_operand.hbm [shape: f32[16,32], index: 4, kind: output, shape index: {}]  }
   0x1   :  { %v1631_v0 = vld [vmem:[%s1922_s0] sm:$0xff]  ;;  %v1636_v1 = vld [vmem:[%s1922_s0 + $0x8] sm:$0xff] }
   0x2   :  { %v26_v2 = vsel %vm25_vm0, %v1631_v0, 0.0  ;;  %v29_v3 = vsel %vm25_vm0, %v1636_v1, 0.0 }
   0x3   :  { %27 = vadd.xlane.f32.xlu0 %v26_v2 }
   0x7   :  { %30 = vadd.xlane.f32.xlu0 %v29_v3 }
   0x8   :  { %9 = vsyncpa [#allocation3], 0  ;;  %v1506_v14 = vld [vmem:[%s1924_s2] sm:$0xff]   ;;  %v1598_v16 = vmov 0.0   ;;  %v1508_v17 = vld [vmem:[%s1924_s2 + $0x8] sm:$0xff]   ;;  %vm1599_vm1 = vmmov 0  }
   0x9   :  { %v1507_v15 = vld [vmem:[%s1924_s2 + $0x40] sm:$0xff]   ;;  %1365 = vmatprep.subr.bf16.mxu1 %v1598_v16  ;;  %1379 = vmatprep.subr.bf16.mxu0 %v1598_v16  ;;  %v1509_v18 = vld [vmem:[%s1924_s2 + $0x48] sm:$0xff]   ;;  %v1510_v49 = vld [vmem:[%s1924_s2 + $0x10] sm:$0xff]   ;;  %vm180_vm2 = vcmask 130048   ;;  %vm1197_vm3 = vcmask 523264   ;;  %s1600_s9 = smov [#allocation2]  }
   0xa   :  { %1366 = vmatpush3.bf16.msra.mxu1 %v1506_v14  ;;  %1380 = vmatpush3.bf16.msra.mxu0 %v1507_v15  ;;  %v1262_v27 = vld [vmem:[%s1925_s3] ss:$0 sm:$0xff]  ;;  %v1263_v31 = vld [vmem:[%s1925_s3 + $0x1] ss:$0 sm:$0xff]  ;;  %v1264_v37 = vld [vmem:[%s1925_s3 + $0x7] ss:$0 sm:$0xff] }
   0xb   :  { %1367 = vmatprep.subr.bf16.mxu1 %v1598_v16  ;;  %1381 = vmatprep.subr.bf16.mxu0 %v1598_v16  ;;  %v1511_v51 = vld [vmem:[%s1924_s2 + $0x18] sm:$0xff]   ;;  %v1512_v52 = vld [vmem:[%s1924_s2 + $0x50] sm:$0xff]   ;;  %v1272_v58 = vld [vmem:[%s1925_s3 + $0x8] ss:$0 sm:$0xff]  ;;  %s1251_s10 = sshll.u32 %s1600_s9, 4  ;;  %s1252_s10 = int_to_ptr.vmem [resolvable:$true] %s1251_s10 }
   0xc   :  { %1369 = vmatprep.mubr.msk.bf16.mxu1 %vm1599_vm1, %v1598_v16  ;;  %1383 = vmatprep.mubr.msk.bf16.mxu0 %vm1599_vm1, %v1598_v16  ;;  %v1513_v53 = vld [vmem:[%s1924_s2 + $0x58] sm:$0xff]   ;;  %s1574_s11 = scalar_lea.vmem %s1252_s10, 256  ;;  %p1579_p1 = scmp.lt.s32.totalorder %s1252_s10, %s1252_s10 }
   0xd   :  { %p1575_p0 = scmp.ne.s32.totalorder %s1252_s10, %s1574_s11  ;;  %p1580_p2 = scmp.lt.s32.totalorder %s1574_s11, %s1574_s11 }
   0xe   :  { %1368 = vmatpush3.bf16.msra.mxu1 %v1508_v17  ;;  %1382 = vmatpush3.bf16.msra.mxu0 %v1509_v18 }
   0xf   :  { %1373 = vmatprep.subr.bf16.mxu1 %v1598_v16  ;;  %1395 = vmatprep.subr.bf16.mxu0 %v1598_v16  ;;  %p1581_p3 = por %p1580_p2, %p1579_p1 }
  0x11   :  { %p1582_p4 = pnand %p1581_p3, %p1575_p0 }
  0x90   :  { %v28_v4 = vpop.xlane.xlu0 %27 }
  0x91   :  { %v33_v5 = vmul.f32 0.03125, %v28_v4 }
  0x93   :  { %v35_v6 = vsub.f32 %v1631_v0, %v33_v5 }
  0x94   :  { %v31_v7 = vpop.xlane.xlu0 %30 }
  0x95   :  { %v34_v8 = vmul.f32 0.03125, %v31_v7  ;;  %v37_v9 = vmul.f32 %v35_v6, %v35_v6 }
  0x97   :  { %v36_v10 = vsub.f32 %v1636_v1, %v34_v8  ;;  %v39_v11 = vsel %vm25_vm0, %v37_v9, 0.0  ;;  %v1733_v9 = vld [vmem:[%s1923_s1] sm:$0xff] }
  0x98   :  { %40 = vadd.xlane.f32.xlu1 %v39_v11 }
  0x99   :  { %v38_v12 = vmul.f32 %v36_v10, %v36_v10 }
  0x9b   :  { %v42_v13 = vsel %vm25_vm0, %v38_v12, 0.0 }
  0x9c   :  { %43 = vadd.xlane.f32.xlu1 %v42_v13  ;;  %v1739_v13 = vld [vmem:[%s1923_s1 + $0x8] sm:$0xff] }
 0x125   :  { %v41_v19 = vpop.xlane.xlu1 %40 }
 0x126   :  { %v45_v20 = vmul.f32 0.03125, %v41_v19 }
 0x128   :  { %v47_v21 = vadd.f32 1e-06, %v45_v20 }
 0x129   :  { %v44_v22 = vpop.xlane.xlu1 %43 }
 0x12a   :  { %1530 = vrsqrt.f32 %v47_v21  ;;  %v46_v23 = vmul.f32 0.03125, %v44_v22 }
 0x12c   :  { %v48_v24 = vadd.f32 1e-06, %v46_v23 }
 0x12e   :  { %1532 = vrsqrt.f32 %v48_v24 }
 0x134   :  { %v1531_v25 = vpop.eup %1530 }
 0x135   :  { %v51_v26 = vmul.f32 %v1531_v25, %v35_v6 }
 0x137   :  { %v57_v29 = vmul.f32 %v1262_v27, %v51_v26 }
 0x138   :  { %v1533_v28 = vpop.eup %1532 }
 0x139   :  { %v52_v30 = vmul.f32 %v1533_v28, %v36_v10  ;;  %v63_v33 = vadd.f32 %v1263_v31, %v57_v29 }
 0x13b   :  { %v58_v32 = vmul.f32 %v1262_v27, %v52_v30 }
 0x13d   :  { %v64_v34 = vadd.f32 %v1263_v31, %v58_v32 }
 0x13f   :  { %v1674_v35 = vpack.c.bf16 %v64_v34, %v63_v33 }
 0x141   :  { %1370 = vmatmul.mubr.msk.bf16.vlgmr.msra.gmra.mrb[0].mxu1 %vm25_vm0, %v1674_v35  ;;  %1384 = vmatmul.mubr.msk.bf16.vlgmr.msra.gmra.mrb[0].mxu0 %vm25_vm0, %v1674_v35  ;;  %v1682_v36 = vsel %vm25_vm0, %v1674_v35, 0 }
 0x142   :  { %1374 = vmatpush3.bf16.xpose.msra.mxu1 %v1682_v36  ;;  %1396 = vmatpush3.bf16.xpose.msra.mxu0 %v1682_v36 }
 0x143   :  { %1375 = vmatprep.mubr.msk.bf16.mxu1 %vm1599_vm1, %v1598_v16  ;;  %1387 = vmatprep.subr.bf16.mxu1 %v1598_v16 }
 0x144   :  { %1397 = vmatprep.mubr.msk.bf16.mxu0 %vm1599_vm1, %v1598_v16  ;;  %1409 = vmatprep.subr.bf16.mxu0 %v1598_v16 }
 0x214   :  { %v128_v38 = vpop.f32.mrb[0].mxu1  ;;  %v249_v39 = vpop.f32.mrb[0].mxu0 }
 0x215   :  { %v1371_v40 = vpop.f32.mrb[1].mxu1  ;;  %v1385_v41 = vpop.f32.mrb[1].mxu0  ;;  %v129_v44 = vadd.f32 %v1264_v37, %v128_v38 }
 0x216   :  { %v131_v42 = vpop.f32.mrb[2].mxu1  ;;  %v252_v43 = vpop.f32.mrb[2].mxu0 }
 0x217   :  { %v132_v45 = vadd.f32 %v1264_v37, %v131_v42  ;;  %v257_v46 = vpack.c.bf16 %v252_v43, %v249_v39  ;;  %v1372_v47 = vpop.f32.mrb[3].mxu1  ;;  %v1386_v48 = vpop.f32.mrb[3].mxu0 }
 0x218   :  { %v1514_v48 = vld [vmem:[%s1924_s2 + $0x20] sm:$0xff]  }
 0x219   :  { %v135_v50 = vpack.c.bf16 %v132_v45, %v129_v44 }
 0x21b   :  { %1376 = vmatmul.mubr.msk.bf16.vlgmr.msra.gmra.mrb[4].mxu1 %vm25_vm0, %v135_v50 }
 0x21c   :  { %1388 = vmatpush3.bf16.msra.mxu1 %v1510_v49  ;;  %1391 = vmatprep.mubr.msk.bf16.mxu1 %vm1599_vm1, %v1598_v16 }
 0x21d   :  { %1389 = vmatprep.subr.bf16.mxu1 %v1598_v16 }
 0x220   :  { %1390 = vmatpush3.bf16.msra.mxu1 %v1511_v51  ;;  %v1515_v51 = vld [vmem:[%s1924_s2 + $0x28] sm:$0xff]  }
 0x221   :  { %1401 = vmatprep.subr.bf16.mxu1 %v1598_v16 }
 0x223   :  { %1392 = vmatmul.mubr.msk.bf16.vlgmr.msra.gmra.mrb[8].mxu1 %vm25_vm0, %v1674_v35 }
 0x224   :  { %1402 = vmatpush3.bf16.msra.mxu1 %v1512_v52  ;;  %1405 = vmatprep.mubr.msk.bf16.mxu1 %vm1599_vm1, %v1598_v16 }
 0x225   :  { %1403 = vmatprep.subr.bf16.mxu1 %v1598_v16 }
 0x228   :  { %1404 = vmatpush3.bf16.msra.mxu1 %v1513_v53 }
 0x229   :  { %1415 = vmatprep.subr.bf16.mxu1 %v1598_v16 }
 0x22b   :  { %1406 = vmatmul.mubr.msk.bf16.vlgmr.msra.gmra.mrb[12].mxu1 %vm25_vm0, %v1674_v35 }
 0x22c   :  { %1416 = vmatpush3.bf16.msra.mxu1 %v257_v46  ;;  %1417 = vmatprep.mubr.msk.bf16.mxu1 %vm1599_vm1, %v1598_v16 }
 0x22d   :  { %1429 = vmatprep.subr.bf16.mxu1 %v1598_v16 }
 0x2ee   :  { %v173_v54 = vpop.f32.mrb[4].mxu1 }
 0x2ef   :  { %v1377_v55 = vpop.f32.mrb[5].mxu1  ;;  %v174_v27 = vadd.f32 %v173_v54, %v1733_v9 }
 0x2f0   :  { %v176_v56 = vpop.f32.mrb[6].mxu1  ;;  %v1516_v55 = vld [vmem:[%s1924_s2 + $0x60] sm:$0xff]  }
 0x2f1   :  { %v1378_v57 = vpop.f32.mrb[7].mxu1  ;;  %v177_v30 = vadd.f32 %v176_v56, %v1739_v13  ;;  %v181_v32 = vsel %vm180_vm2, %v174_v27, -inf  ;;  %v1517_v56 = vld [vmem:[%s1924_s2 + $0x68] sm:$0xff]  }
 0x2f2   :  { %v1518_v57 = vld [vmem:[%s1924_s2 + $0x30] sm:$0xff]  }
 0x2f3   :  { %v184_v33 = vsel %vm180_vm2, %v177_v30, -inf }
 0x2f6   :  { %v317_v59 = vpop.f32.mrb[8].mxu1 }
 0x2f7   :  { %v1393_v60 = vpop.f32.mrb[9].mxu1  ;;  %v318_v62 = vadd.f32 %v1272_v58, %v317_v59  ;;  %v1520_v59 = vld [vmem:[%s1924_s2 + $0x70] sm:$0xff]  }
 0x2f8   :  { %v320_v61 = vpop.f32.mrb[10].mxu1  ;;  %v1521_v60 = vld [vmem:[%s1924_s2 + $0x78] sm:$0xff]  }
 0x2f9   :  { %v321_v63 = vadd.f32 %v1272_v58, %v320_v61  ;;  %v1394_v2 = vpop.f32.mrb[11].mxu1  ;;  %v1519_v58 = vld [vmem:[%s1924_s2 + $0x38] sm:$0xff]  }
 0x2fb   :  { %v324_v3 = vpack.c.bf16 %v321_v63, %v318_v62 }
 0x2fd   :  { %1398 = vmatmul.mubr.msk.bf16.vlgmr.msra.gmra.mrb[4].mxu0 %vm25_vm0, %v324_v3 }
 0x2fe   :  { %v437_v4 = vpop.f32.mrb[12].mxu1  ;;  %1411 = vmatprep.mubr.msk.bf16.mxu0 %vm1599_vm1, %v1598_v16 }
 0x2ff   :  { %v1407_v5 = vpop.f32.mrb[13].mxu1 }
 0x300   :  { %v440_v6 = vpop.f32.mrb[14].mxu1 }
 0x301   :  { %v445_v7 = vpack.c.bf16 %v440_v6, %v437_v4  ;;  %v1408_v8 = vpop.f32.mrb[15].mxu1 }
 0x303   :  { %1410 = vmatpush3.bf16.msra.mxu0 %v445_v7 }
 0x304   :  { %1421 = vmatprep.subr.bf16.mxu0 %v1598_v16 }
 0x3d0   :  { %v362_v10 = vpop.f32.mrb[4].mxu0 }
 0x3d1   :  { %v363_v11 = vadd.f32 %v362_v10, %v1733_v9  ;;  %v1399_v12 = vpop.f32.mrb[5].mxu0  ;;  %v1282_v10 = vld [vmem:[%s1925_s3 + $0x9] ss:$0 sm:$0xff] }
 0x3d2   :  { %v365_v14 = vpop.f32.mrb[6].mxu0 }
 0x3d3   :  { %v366_v15 = vadd.f32 %v365_v14, %v1739_v13  ;;  %v1400_v17 = vpop.f32.mrb[7].mxu0  ;;  %v369_v18 = vsel %vm180_vm2, %v363_v11, -inf }
 0x3d4   :  { %370 = vmax.xlane.f32.xlu0 %v369_v18 }
 0x3d5   :  { %v372_v19 = vsel %vm180_vm2, %v366_v15, -inf }
 0x3d6   :  { %373 = vmax.xlane.f32.xlu1 %v372_v19 }
 0x461   :  { %v371_v20 = vpop.xlane.xlu0 %370 }
 0x462   :  { %v375_v21 = vsub.f32 %v363_v11, %v371_v20 }
 0x463   :  { %v374_v22 = vpop.xlane.xlu1 %373 }
 0x464   :  { %v377_v23 = vmul.f32 1.442695, %v375_v21  ;;  %v376_v24 = vsub.f32 %v366_v15, %v374_v22 }
 0x466   :  { %1534 = vpow2.f32 %v377_v23  ;;  %v379_v25 = vmul.f32 1.442695, %v376_v24 }
 0x468   :  { %1536 = vpow2.f32 %v379_v25  ;;  %v1291_v25 = vld [vmem:[%s1925_s3 + $0xa] ss:$0 sm:$0xff] }
 0x470   :  { %v1535_v26 = vpop.eup %1534 }
 0x471   :  { %v381_v28 = vsel %vm180_vm2, %v1535_v26, 0.0 }
 0x472   :  { %v1537_v29 = vpop.eup %1536  ;;  %382 = vadd.xlane.f32.xlu0 %v381_v28 }
 0x473   :  { %v384_v31 = vsel %vm180_vm2, %v1537_v29, 0.0 }
 0x474   :  { %385 = vadd.xlane.f32.xlu1 %v384_v31 }
 0x476   :  { %182 = vmax.xlane.f32.xlu0 %v181_v32 }
 0x478   :  { %185 = vmax.xlane.f32.xlu1 %v184_v33 }
 0x4ff   :  { %v383_v34 = vpop.xlane.xlu0 %382 }
 0x500   :  { %1538 = vrcp.f32 %v383_v34 }
 0x501   :  { %v386_v37 = vpop.xlane.xlu1 %385 }
 0x502   :  { %1540 = vrcp.f32 %v386_v37 }
 0x503   :  { %v183_v38 = vpop.xlane.xlu0 %182 }
 0x504   :  { %v187_v39 = vsub.f32 %v174_v27, %v183_v38 }
 0x505   :  { %v186_v40 = vpop.xlane.xlu1 %185 }
 0x506   :  { %v189_v41 = vmul.f32 1.442695, %v187_v39  ;;  %v188_v42 = vsub.f32 %v177_v30, %v186_v40 }
 0x508   :  { %1542 = vpow2.f32 %v189_v41  ;;  %v191_v43 = vmul.f32 1.442695, %v188_v42 }
 0x50a   :  { %v1539_v44 = vpop.eup %1538  ;;  %1544 = vpow2.f32 %v191_v43 }
 0x50b   :  { %v388_v46 = vmul.f32 %v1539_v44, %v1535_v26 }
 0x50c   :  { %v1541_v45 = vpop.eup %1540 }
 0x50d   :  { %v390_v47 = vmul.f32 %v1541_v45, %v1537_v29 }
 0x50f   :  { %v444_v49 = vpack.c.bf16 %v390_v47, %v388_v46 }
 0x511   :  { %1412 = vmatmul.mubr.msk.bf16.vlgmr.msra.gmra.mrb[8].mxu0 %vm180_vm2, %v444_v49 }
 0x512   :  { %v1543_v50 = vpop.eup %1542  ;;  %1422 = vmatpush3.bf16.msra.mxu0 %v1514_v48  ;;  %1425 = vmatprep.mubr.msk.bf16.mxu0 %vm1599_vm1, %v1598_v16 }
 0x513   :  { %v193_v52 = vsel %vm180_vm2, %v1543_v50, 0.0  ;;  %1423 = vmatprep.subr.bf16.mxu0 %v1598_v16 }
 0x514   :  { %v1545_v53 = vpop.eup %1544  ;;  %194 = vadd.xlane.f32.xlu0 %v193_v52 }
 0x515   :  { %v196_v54 = vsel %vm180_vm2, %v1545_v53, 0.0 }
 0x516   :  { %1424 = vmatpush3.bf16.msra.mxu0 %v1515_v51  ;;  %197 = vadd.xlane.f32.xlu1 %v196_v54 }
 0x517   :  { %1435 = vmatprep.subr.bf16.mxu0 %v1598_v16 }
 0x519   :  { %1426 = vmatmul.mubr.msk.bf16.vlgmr.msra.gmra.mrb[12].mxu0 %vm25_vm0, %v1674_v35 }
 0x51a   :  { %1436 = vmatpush3.bf16.msra.mxu0 %v1516_v55  ;;  %1439 = vmatprep.mubr.msk.bf16.mxu0 %vm1599_vm1, %v1598_v16 }
 0x51b   :  { %1437 = vmatprep.subr.bf16.mxu0 %v1598_v16 }
 0x51e   :  { %1438 = vmatpush3.bf16.msra.mxu0 %v1517_v56 }
 0x51f   :  { %1449 = vmatprep.subr.bf16.mxu0 %v1598_v16 }
 0x521   :  { %1440 = vmatmul.mubr.msk.bf16.vlgmr.msra.gmra.mrb[16].mxu0 %vm25_vm0, %v1674_v35 }
 0x522   :  { %1450 = vmatpush3.bf16.msra.mxu0 %v1518_v57  ;;  %1453 = vmatprep.mubr.msk.bf16.mxu0 %vm1599_vm1, %v1598_v16 }
 0x523   :  { %1451 = vmatprep.subr.bf16.mxu0 %v1598_v16 }
 0x526   :  { %1452 = vmatpush3.bf16.msra.mxu0 %v1519_v58 }
 0x527   :  { %1463 = vmatprep.subr.bf16.mxu0 %v1598_v16 }
 0x529   :  { %1454 = vmatmul.mubr.msk.bf16.vlgmr.msra.gmra.mrb[20].mxu0 %vm25_vm0, %v1674_v35 }
 0x52a   :  { %1464 = vmatpush3.bf16.msra.mxu0 %v1520_v59  ;;  %1467 = vmatprep.mubr.msk.bf16.mxu0 %vm1599_vm1, %v1598_v16 }
 0x52b   :  { %1465 = vmatprep.subr.bf16.mxu0 %v1598_v16 }
 0x52e   :  { %1466 = vmatpush3.bf16.msra.mxu0 %v1521_v60 }
 0x52f   :  { %1477 = vmatprep.subr.bf16.mxu0 %v1598_v16 }
 0x531   :  { %1468 = vmatmul.mubr.msk.bf16.vlgmr.msra.gmra.mrb[24].mxu0 %vm25_vm0, %v1674_v35 }
 0x532   :  { %1485 = vmatprep.mubr.msk.bf16.mxu0 %vm1599_vm1, %v1598_v16 }
 0x5a1   :  { %v195_v61 = vpop.xlane.xlu0 %194 }
 0x5a2   :  { %1546 = vrcp.f32 %v195_v61 }
 0x5a3   :  { %v198_v62 = vpop.xlane.xlu1 %197 }
 0x5a4   :  { %1548 = vrcp.f32 %v198_v62 }
 0x5ac   :  { %v1547_v63 = vpop.eup %1546 }
 0x5ad   :  { %v200_v3 = vmul.f32 %v1547_v63, %v1543_v50 }
 0x5ae   :  { %v1549_v2 = vpop.eup %1548 }
 0x5af   :  { %v202_v4 = vmul.f32 %v1549_v2, %v1545_v53 }
 0x5b1   :  { %v256_v5 = vpack.c.bf16 %v202_v4, %v200_v3 }
 0x5b3   :  { %1418 = vmatmul.mubr.msk.bf16.vlgmr.msra.gmra.mrb[16].mxu1 %vm180_vm2, %v256_v5 }
 0x5b4   :  { %1430 = vmatpush3.bf16.xpose.msra.mxu1 %v1682_v36  ;;  %1431 = vmatprep.mubr.msk.bf16.mxu1 %vm1599_vm1, %v1598_v16 }
 0x5b5   :  { %1443 = vmatprep.subr.bf16.mxu1 %v1598_v16 }
 0x5e4   :  { %v483_v35 = vpop.f32.mrb[8].mxu0 }
 0x5e5   :  { %v1413_v6 = vpop.f32.mrb[9].mxu0 }
 0x5e6   :  { %v486_v7 = vpop.f32.mrb[10].mxu0 }
 0x5e7   :  { %v1414_v8 = vpop.f32.mrb[11].mxu0 }
 0x5ec   :  { %v593_v11 = vpop.f32.mrb[12].mxu0 }
 0x5ed   :  { %v1427_v12 = vpop.f32.mrb[13].mxu0  ;;  %v594_v15 = vadd.f32 %v1282_v10, %v593_v11 }
 0x5ee   :  { %v596_v14 = vpop.f32.mrb[14].mxu0 }
 0x5ef   :  { %v597_v17 = vadd.f32 %v1282_v10, %v596_v14  ;;  %v1428_v18 = vpop.f32.mrb[15].mxu0 }
 0x5f1   :  { %v600_v19 = vpack.c.bf16 %v597_v17, %v594_v15 }
 0x5f3   :  { %1432 = vmatmul.mubr.msk.bf16.vlgmr.msra.gmra.mrb[20].mxu1 %vm25_vm0, %v600_v19 }
 0x5f4   :  { %v713_v20 = vpop.f32.mrb[16].mxu0  ;;  %1445 = vmatprep.mubr.msk.bf16.mxu1 %vm1599_vm1, %v1598_v16 }
 0x5f5   :  { %v1441_v21 = vpop.f32.mrb[17].mxu0 }
 0x5f6   :  { %v716_v22 = vpop.f32.mrb[18].mxu0 }
 0x5f7   :  { %v721_v23 = vpack.c.bf16 %v716_v22, %v713_v20  ;;  %v1442_v24 = vpop.f32.mrb[19].mxu0 }
 0x5f9   :  { %1444 = vmatpush3.bf16.msra.mxu1 %v721_v23 }
 0x5fa   :  { %1457 = vmatprep.subr.bf16.mxu1 %v1598_v16 }
 0x5fc   :  { %v827_v26 = vpop.f32.mrb[20].mxu0 }
 0x5fd   :  { %v1455_v27 = vpop.f32.mrb[21].mxu0  ;;  %v828_v29 = vadd.f32 %v1291_v25, %v827_v26 }
 0x5fe   :  { %v830_v28 = vpop.f32.mrb[22].mxu0 }
 0x5ff   :  { %v831_v30 = vadd.f32 %v1291_v25, %v830_v28  ;;  %v1456_v31 = vpop.f32.mrb[23].mxu0 }
 0x601   :  { %v834_v32 = vpack.c.bf16 %v831_v30, %v828_v29 }
 0x604   :  { %v947_v33 = vpop.f32.mrb[24].mxu0 }
 0x605   :  { %v1469_v34 = vpop.f32.mrb[25].mxu0 }
 0x606   :  { %v950_v37 = vpop.f32.mrb[26].mxu0 }
 0x607   :  { %v955_v38 = vpack.c.bf16 %v950_v37, %v947_v33  ;;  %v1470_v39 = vpop.f32.mrb[27].mxu0 }
 0x686   :  { %v527_v40 = vpop.f32.mrb[16].mxu1 }
 0x687   :  { %v528_v41 = vadd.f32 %v527_v40, %v483_v35  ;;  %v1419_v42 = vpop.f32.mrb[17].mxu1 }
 0x688   :  { %v530_v43 = vpop.f32.mrb[18].mxu1  ;;  %v1300_v42 = vld [vmem:[%s1925_s3 + $0x4] ss:$0 sm:$0xff] }
 0x689   :  { %v531_v44 = vadd.f32 %v530_v43, %v486_v7  ;;  %v1420_v45 = vpop.f32.mrb[19].mxu1 }
 0x6c6   :  { %v638_v46 = vpop.f32.mrb[20].mxu1 }
 0x6c7   :  { %v639_v47 = vadd.f32 %v638_v46, %v1733_v9  ;;  %v1433_v48 = vpop.f32.mrb[21].mxu1 }
 0x6c8   :  { %v641_v49 = vpop.f32.mrb[22].mxu1 }
 0x6c9   :  { %v642_v50 = vadd.f32 %v641_v49, %v1739_v13  ;;  %v1434_v51 = vpop.f32.mrb[23].mxu1  ;;  %v645_v52 = vsel %vm180_vm2, %v639_v47, -inf }
 0x6ca   :  { %646 = vmax.xlane.f32.xlu0 %v645_v52 }
 0x6cb   :  { %v648_v53 = vsel %vm180_vm2, %v642_v50, -inf }
 0x6cc   :  { %649 = vmax.xlane.f32.xlu1 %v648_v53 }
 0x757   :  { %v647_v54 = vpop.xlane.xlu0 %646 }
 0x758   :  { %v651_v55 = vsub.f32 %v639_v47, %v647_v54  ;;  %v1522_v54 = vld [vmem:[%s1924_s2 + $0x80] sm:$0xff]  }
 0x759   :  { %v650_v56 = vpop.xlane.xlu1 %649 }
 0x75a   :  { %v653_v57 = vmul.f32 1.442695, %v651_v55  ;;  %v652_v58 = vsub.f32 %v642_v50, %v650_v56  ;;  %v1097_v55 = vsel %vm25_vm0, %v1522_v54, 0 }
 0x75b   :  { %1478 = vmatpush3.bf16.xpose.msra.mxu0 %v1097_v55 }
 0x75c   :  { %1550 = vpow2.f32 %v653_v57  ;;  %v655_v59 = vmul.f32 1.442695, %v652_v58  ;;  %1479 = vmatprep.subr.bf16.mxu0 %v1598_v16 }
 0x75e   :  { %1552 = vpow2.f32 %v655_v59 }
 0x766   :  { %v1551_v60 = vpop.eup %1550 }
 0x767   :  { %v657_v61 = vsel %vm180_vm2, %v1551_v60, 0.0 }
 0x768   :  { %v1553_v62 = vpop.eup %1552  ;;  %658 = vadd.xlane.f32.xlu0 %v657_v61 }
 0x769   :  { %v660_v63 = vsel %vm180_vm2, %v1553_v62, 0.0 }
 0x76a   :  { %661 = vadd.xlane.f32.xlu1 %v660_v63 }
 0x7f5   :  { %v659_v2 = vpop.xlane.xlu0 %658 }
 0x7f6   :  { %1554 = vrcp.f32 %v659_v2  ;;  %v1523_v2 = vld [vmem:[%s1924_s2 + $0x88] sm:$0xff]  }
 0x7f7   :  { %v662_v3 = vpop.xlane.xlu1 %661 }
 0x7f8   :  { %1556 = vrcp.f32 %v662_v3  ;;  %v1100_v3 = vsel %vm25_vm0, %v1523_v2, 0 }
 0x7f9   :  { %1480 = vmatpush3.bf16.xpose.msra.mxu0 %v1100_v3 }
 0x7fa   :  { %1481 = vmatprep.subr.bf16.mxu0 %v1598_v16 }
 0x800   :  { %v1555_v4 = vpop.eup %1554 }
 0x801   :  { %v664_v35 = vmul.f32 %v1555_v4, %v1551_v60  ;;  %v1524_v4 = vld [vmem:[%s1924_s2 + $0x90] sm:$0xff]  }
 0x802   :  { %v1557_v5 = vpop.eup %1556 }
 0x803   :  { %v666_v6 = vmul.f32 %v1557_v5, %v1553_v62  ;;  %v1103_v5 = vsel %vm25_vm0, %v1524_v4, 0 }
 0x804   :  { %1482 = vmatpush3.bf16.xpose.msra.mxu0 %v1103_v5 }
 0x805   :  { %v720_v7 = vpack.c.bf16 %v666_v6, %v664_v35  ;;  %1483 = vmatprep.subr.bf16.mxu0 %v1598_v16  ;;  %v1525_v35 = vld [vmem:[%s1924_s2 + $0x98] sm:$0xff]  }
 0x806   :  { %v1106_v6 = vsel %vm25_vm0, %v1525_v35, 0 }
 0x807   :  { %1446 = vmatmul.mubr.msk.bf16.vlgmr.msra.gmra.mrb[24].mxu1 %vm180_vm2, %v720_v7 }
 0x808   :  { %1458 = vmatpush3.bf16.xpose.msra.mxu1 %v1682_v36  ;;  %1459 = vmatprep.mubr.msk.bf16.mxu1 %vm1599_vm1, %v1598_v16 }
 0x809   :  { %1471 = vmatprep.subr.bf16.mxu1 %v1598_v16 }
 0x80c   :  { %1484 = vmatpush3.bf16.xpose.msra.mxu0 %v1106_v6 }
 0x80f   :  { %1460 = vmatmul.mubr.msk.bf16.vlgmr.msra.gmra.mrb[28].mxu1 %vm25_vm0, %v834_v32 }
 0x810   :  { %1472 = vmatpush3.bf16.msra.mxu1 %v955_v38  ;;  %1473 = vmatprep.mubr.msk.bf16.mxu1 %vm1599_vm1, %v1598_v16 }
 0x811   :  { %1489 = vmatprep.subr.bf16.mxu1 %v1598_v16 }
 0x8da   :  { %v759_v8 = vpop.f32.mrb[24].mxu1 }
 0x8db   :  { %v766_v10 = vadd.f32 %v759_v8, %v528_v41  ;;  %v1447_v11 = vpop.f32.mrb[25].mxu1 }
 0x8dc   :  { %v762_v12 = vpop.f32.mrb[26].mxu1 }
 0x8dd   :  { %v767_v14 = vadd.f32 %v762_v12, %v531_v44  ;;  %v1448_v15 = vpop.f32.mrb[27].mxu1 }
 0x8e2   :  { %v872_v36 = vpop.f32.mrb[28].mxu1 }
 0x8e3   :  { %v873_v17 = vadd.f32 %v872_v36, %v1733_v9  ;;  %v1461_v18 = vpop.f32.mrb[29].mxu1  ;;  %v1301_v36 = vld [vmem:[%s1925_s3 + $0x2] ss:$0 sm:$0xff] }
 0x8e4   :  { %v875_v19 = vpop.f32.mrb[30].mxu1 }
 0x8e5   :  { %v876_v20 = vadd.f32 %v875_v19, %v1739_v13  ;;  %v1462_v21 = vpop.f32.mrb[31].mxu1  ;;  %v879_v22 = vsel %vm180_vm2, %v873_v17, -inf }
 0x8e6   :  { %880 = vmax.xlane.f32.xlu0 %v879_v22  ;;  %v1302_v21 = vld [vmem:[%s1925_s3 + $0x3] ss:$0 sm:$0xff] }
 0x8e7   :  { %v882_v23 = vsel %vm180_vm2, %v876_v20, -inf }
 0x8e8   :  { %883 = vmax.xlane.f32.xlu1 %v882_v23 }
 0x973   :  { %v881_v24 = vpop.xlane.xlu0 %880 }
 0x974   :  { %v885_v25 = vsub.f32 %v873_v17, %v881_v24 }
 0x975   :  { %v884_v26 = vpop.xlane.xlu1 %883 }
 0x976   :  { %v887_v27 = vmul.f32 1.442695, %v885_v25  ;;  %v886_v28 = vsub.f32 %v876_v20, %v884_v26  ;;  %v1526_v26 = vld [vmem:[%s1924_s2 + $0xa0] sm:$0xff]  }
 0x978   :  { %1558 = vpow2.f32 %v887_v27  ;;  %v889_v29 = vmul.f32 1.442695, %v886_v28  ;;  %v1527_v27 = vld [vmem:[%s1924_s2 + $0xa8] sm:$0xff]   ;;  %v1528_v28 = vld [vmem:[%s1924_s2 + $0xb0] sm:$0xff]  }
 0x97a   :  { %1560 = vpow2.f32 %v889_v29  ;;  %v1529_v29 = vld [vmem:[%s1924_s2 + $0xb8] sm:$0xff]  }
 0x982   :  { %v1559_v9 = vpop.eup %1558 }
 0x983   :  { %v891_v30 = vsel %vm180_vm2, %v1559_v9, 0.0 }
 0x984   :  { %v1561_v31 = vpop.eup %1560  ;;  %892 = vadd.xlane.f32.xlu0 %v891_v30 }
 0x985   :  { %v894_v13 = vsel %vm180_vm2, %v1561_v31, 0.0 }
 0x986   :  { %895 = vadd.xlane.f32.xlu1 %v894_v13 }
 0xa11   :  { %v893_v32 = vpop.xlane.xlu0 %892 }
 0xa12   :  { %1562 = vrcp.f32 %v893_v32 }
 0xa13   :  { %v896_v33 = vpop.xlane.xlu1 %895 }
 0xa14   :  { %1564 = vrcp.f32 %v896_v33 }
 0xa1c   :  { %v1563_v34 = vpop.eup %1562 }
 0xa1d   :  { %v898_v38 = vmul.f32 %v1563_v34, %v1559_v9  ;;  %v1303_v9 = vld [vmem:[%s1925_s3 + $0x6] ss:$0 sm:$0xff] }
 0xa1e   :  { %v1565_v37 = vpop.eup %1564 }
 0xa1f   :  { %v900_v39 = vmul.f32 %v1565_v37, %v1561_v31 }
 0xa21   :  { %v954_v40 = vpack.c.bf16 %v900_v39, %v898_v38 }
 0xa23   :  { %1474 = vmatmul.mubr.msk.bf16.vlgmr.msra.gmra.mrb[32].mxu1 %vm180_vm2, %v954_v40 }
 0xa24   :  { %1497 = vmatprep.mubr.msk.bf16.mxu1 %vm1599_vm1, %v1598_v16  ;;  %1490 = vmatpush3.bf16.msra.mxu1 %v1526_v26 }
 0xa25   :  { %1491 = vmatprep.subr.bf16.mxu1 %v1598_v16 }
 0xa28   :  { %1492 = vmatpush3.bf16.msra.mxu1 %v1527_v27 }
 0xa29   :  { %1493 = vmatprep.subr.bf16.mxu1 %v1598_v16 }
 0xa2c   :  { %1494 = vmatpush3.bf16.msra.mxu1 %v1528_v28 }
 0xa2d   :  { %1495 = vmatprep.subr.bf16.mxu1 %v1598_v16 }
 0xa30   :  { %1496 = vmatpush3.bf16.msra.mxu1 %v1529_v29 }
 0xaf6   :  { %v993_v41 = vpop.f32.mrb[32].mxu1 }
 0xaf7   :  { %v1000_v43 = vadd.f32 %v993_v41, %v766_v10  ;;  %v1475_v44 = vpop.f32.mrb[33].mxu1 }
 0xaf8   :  { %v996_v45 = vpop.f32.mrb[34].mxu1 }
 0xaf9   :  { %v1007_v46 = vadd.f32 %v1300_v42, %v1000_v43  ;;  %v1001_v47 = vadd.f32 %v996_v45, %v767_v14  ;;  %v1476_v48 = vpop.f32.mrb[35].mxu1 }
 0xafb   :  { %v1846_v49 = vadd.f32 %v1007_v46, %v1631_v0  ;;  %v1008_v50 = vadd.f32 %v1300_v42, %v1001_v47 }
 0xafd   :  { %v1849_v51 = vadd.f32 %v1008_v50, %v1636_v1  ;;  %v1013_v52 = vsel %vm25_vm0, %v1846_v49, 0.0 }
 0xafe   :  { %1014 = vadd.xlane.f32.xlu0 %v1013_v52 }
 0xaff   :  { %v1016_v53 = vsel %vm25_vm0, %v1849_v51, 0.0 }
 0xb00   :  { %1017 = vadd.xlane.f32.xlu1 %v1016_v53 }
 0xb8b   :  { %v1015_v0 = vpop.xlane.xlu0 %1014 }
 0xb8c   :  { %v1019_v1 = vmul.f32 0.03125, %v1015_v0 }
 0xb8d   :  { %v1018_v56 = vpop.xlane.xlu1 %1017 }
 0xb8e   :  { %v1021_v57 = vsub.f32 %v1846_v49, %v1019_v1  ;;  %v1020_v58 = vmul.f32 0.03125, %v1018_v56  ;;  %v1309_v1 = vld [vmem:[%s1925_s3 + $0x5] ss:$0 sm:$0xff] }
 0xb90   :  { %v1022_v59 = vsub.f32 %v1849_v51, %v1020_v58  ;;  %v1023_v60 = vmul.f32 %v1021_v57, %v1021_v57 }
 0xb92   :  { %v1025_v61 = vsel %vm25_vm0, %v1023_v60, 0.0  ;;  %v1024_v62 = vmul.f32 %v1022_v59, %v1022_v59 }
 0xb93   :  { %1026 = vadd.xlane.f32.xlu0 %v1025_v61 }
 0xb94   :  { %v1028_v63 = vsel %vm25_vm0, %v1024_v62, 0.0 }
 0xb95   :  { %1029 = vadd.xlane.f32.xlu1 %v1028_v63 }
 0xc20   :  { %v1027_v7 = vpop.xlane.xlu0 %1026 }
 0xc21   :  { %v1031_v8 = vmul.f32 0.03125, %v1027_v7 }
 0xc22   :  { %v1030_v10 = vpop.xlane.xlu1 %1029 }
 0xc23   :  { %v1033_v11 = vadd.f32 1e-06, %v1031_v8  ;;  %v1032_v12 = vmul.f32 0.03125, %v1030_v10 }
 0xc25   :  { %1566 = vrsqrt.f32 %v1033_v11  ;;  %v1034_v14 = vadd.f32 1e-06, %v1032_v12 }
 0xc27   :  { %1568 = vrsqrt.f32 %v1034_v14 }
 0xc2f   :  { %v1567_v15 = vpop.eup %1566 }
 0xc30   :  { %v1037_v17 = vmul.f32 %v1567_v15, %v1021_v57 }
 0xc31   :  { %v1569_v18 = vpop.eup %1568 }
 0xc32   :  { %v1043_v19 = vmul.f32 %v1301_v36, %v1037_v17  ;;  %v1038_v20 = vmul.f32 %v1569_v18, %v1022_v59 }
 0xc34   :  { %v1044_v22 = vmul.f32 %v1301_v36, %v1038_v20  ;;  %v1049_v23 = vadd.f32 %v1302_v21, %v1043_v19 }
 0xc36   :  { %v1050_v24 = vadd.f32 %v1302_v21, %v1044_v22 }
 0xc38   :  { %v1067_v25 = vpack.c.bf16 %v1050_v24, %v1049_v23 }
 0xc3a   :  { %1486 = vmatmul.mubr.msk.bf16.vlgmr.msra.gmra.mrb[28].mxu0 %vm25_vm0, %v1067_v25 }
 0xd0d   :  { %v1142_v30 = vpop.f32.mrb[28].mxu0 }
 0xd0e   :  { %v1143_v31 = vadd.f32 %v1303_v9, %v1142_v30  ;;  %v1487_v13 = vpop.f32.mrb[29].mxu0 }
 0xd0f   :  { %v1145_v32 = vpop.f32.mrb[30].mxu0 }
 0xd10   :  { %v1151_v33 = vmul.f32 0.044715, %v1143_v31  ;;  %v1146_v34 = vadd.f32 %v1303_v9, %v1145_v32  ;;  %v1488_v37 = vpop.f32.mrb[31].mxu0  ;;  %v1149_v50 = vmul.f32 0.5, %v1143_v31 }
 0xd12   :  { %v1153_v38 = vmul.f32 %v1151_v33, %v1143_v31  ;;  %v1152_v39 = vmul.f32 0.044715, %v1146_v34  ;;  %v1150_v52 = vmul.f32 0.5, %v1146_v34 }
 0xd14   :  { %v1155_v40 = vmul.f32 %v1153_v38, %v1143_v31  ;;  %v1154_v41 = vmul.f32 %v1152_v39, %v1146_v34 }
 0xd16   :  { %v1157_v42 = vadd.f32 %v1155_v40, %v1143_v31  ;;  %v1156_v43 = vmul.f32 %v1154_v41, %v1146_v34 }
 0xd18   :  { %v1159_v44 = vmul.f32 0.7978846, %v1157_v42  ;;  %v1158_v16 = vadd.f32 %v1156_v43, %v1146_v34 }
 0xd1a   :  { %1570 = vtanh.f32 %v1159_v44  ;;  %v1160_v45 = vmul.f32 0.7978846, %v1158_v16 }
 0xd1c   :  { %1572 = vtanh.f32 %v1160_v45 }
 0xd24   :  { %v1571_v46 = vpop.eup %1570 }
 0xd25   :  { %v1163_v47 = vadd.f32 1.0, %v1571_v46 }
 0xd26   :  { %v1573_v48 = vpop.eup %1572 }
 0xd27   :  { %v1164_v53 = vadd.f32 1.0, %v1573_v48  ;;  %v1165_v54 = vmul.f32 %v1163_v47, %v1149_v50 }
 0xd29   :  { %v1166_v55 = vmul.f32 %v1164_v53, %v1150_v52 }
 0xd2b   :  { %v1167_v0 = vpack.c.bf16 %v1166_v55, %v1165_v54 }
 0xd2d   :  { %1498 = vmatmul.mubr.msk.bf16.vlgmr.msra.gmra.mrb[36].mxu1 %vm1197_vm3, %v1167_v0 }
 0xe00   :  { %v1235_v56 = vpop.f32.mrb[36].mxu1 }
 0xe01   :  { %v1236_v57 = vadd.f32 %v1309_v1, %v1235_v56  ;;  %v1499_v58 = vpop.f32.mrb[37].mxu1 }
 0xe02   :  { %v1238_v59 = vpop.f32.mrb[38].mxu1 }
 0xe03   :  { %v1242_v60 = vadd.f32 %v1236_v57, %v1846_v49  ;;  %v1239_v61 = vadd.f32 %v1309_v1, %v1238_v59  ;;  %v1500_v62 = vpop.f32.mrb[39].mxu1 }
 0xe05   :  { %1244 = vst.msk [vmem:[#allocation2] sm:$0xff] %vm25_vm0, %v1242_v60  ;;  %v1243_v63 = vadd.f32 %v1239_v61, %v1849_v51 }
 0xe07   :  { %1245 = vst.msk [vmem:[#allocation2 + $0x8] sm:$0xff] %vm25_vm0, %v1243_v63 }
 0xe08   :  { %1585 = shalt.err (!%p1582_p4)
}
 0xe09   :  { %s1586_s13 = scalar_lea.hbm %s1926_s4, 256 }
 0xe0a   :  { %p1587_p5 = scmp.ne.s32.totalorder %s1926_s4, %s1586_s13  ;;  %p1590_p6 = scmp.lt.u32.totalorder %s1586_s13, %s1926_s4 }
 0xe0c   :  { %p1592_p7 = pnand %p1590_p6, %p1587_p5 }
 0xe0e   :  { %1595 = shalt.err (!%p1592_p7)
}
 0xe0f   :  { %s1601_s18 = smov 128   ;;  %s1602_s0 = smov 8  }
 0xe10   :  { %1257 = dma.vmem_to_hbm [thread:$0]  %s1252_s10, 256, %s1926_s4, [#allocation3], %s1601_s18, %s1601_s18, %s1602_s0  }
 0xe11   :  { %1596 = dma.done.wait [#allocation3], 256  }
 0xe12   :  { %1597 = vsyncadd [#allocation3], 4294967040 }
 0xe13   :  { %1261 = vsyncpa [#allocation3], 1 }

</bundles_post_ra>
